<compile_context>
chip_gen: v7x
topology: tpu7x:2x2x1
jax: 0.10.0
libtpu: 0.0.40
codegen_flags: <defaults>
</compile_context>

<pallas_src>
import functools

import numpy as np
import jax
import jax.numpy as jnp
from jax.experimental import pallas as pl
from jax.experimental.pallas import tpu as pltpu

BN_EPS = 1e-5
LANE = 128
NEG_BIG = -1e30
XW_RESIDENT_LIMIT = 24 * 1024 * 1024  # bytes of resident XW; v7x-safe (64 MiB physical VMEM)


def _round_up(x, m):
    return (x + m - 1) // m * m


def _pick_tile(n_pad, pref):
    """Largest multiple of LANE that divides n_pad and is <= pref (>= LANE)."""
    best = LANE
    t = LANE
    limit = min(pref, n_pad)
    while t <= limit:
        if n_pad % t == 0:
            best = t
        t += LANE
    return best


def _vmem_cap_bytes():
    try:
        return int(pltpu.get_tpu_info().vmem_capacity_bytes)
    except Exception:
        return 64 * 1024 * 1024  # conservative: v7x per-core physical VMEM


# --------------------------- Kernel 1: XW = X @ W (row-tiled) ---------------------------


def _xw_kernel(x_ref, w_ref, out_ref):
    out_ref[...] = jnp.dot(
        x_ref[...], w_ref[...], preferred_element_type=jnp.float32
    ).astype(out_ref.dtype)


def compute_xw(x_bf16, w_bf16, *, tm, vmem_limit):
    n, f_in = x_bf16.shape
    f_out = w_bf16.shape[1]
    cost = pl.CostEstimate(
        flops=2 * n * f_in * f_out,
        transcendentals=0,
        # W has a constant index_map -> DMA'd once, not once per row tile.
        bytes_accessed=2 * (n * f_in + f_in * f_out + n * f_out),
    )
    return pl.pallas_call(
        _xw_kernel,
        out_shape=jax.ShapeDtypeStruct((n, f_out), jnp.bfloat16),
        grid_spec=pltpu.PrefetchScalarGridSpec(
            num_scalar_prefetch=0,
            grid=(n // tm,),
            in_specs=[
                pl.BlockSpec((tm, f_in), lambda i: (i, 0)),
                pl.BlockSpec((f_in, f_out), lambda i: (0, 0)),  # W resident
            ],
            out_specs=pl.BlockSpec((tm, f_out), lambda i: (i, 0)),
        ),
        compiler_params=pltpu.CompilerParams(
            dimension_semantics=("parallel",),
            vmem_limit_bytes=vmem_limit,
        ),
        cost_estimate=cost,
    )(x_bf16, w_bf16)


# ---------- Kernel 2: block-sparse A_hat @ XW + fused dequant/bias/activation ----------


def _agg_kernel(cols_ref, cnt_ref, a_ref, xw_ref, rs_ref, b_ref, out_ref, acc_ref, *,
                is_final, valid_cols, valid_rows, tm, tk, xw_resident):
    i = pl.program_id(0)
    j = pl.program_id(1)

    @pl.when(j == 0)
    def _():
        acc_ref[...] = jnp.zeros_like(acc_ref)

    # Only accumulate for non-empty adjacency blocks of this row tile.
    @pl.when(j < cnt_ref[i])
    def _():
        a_bf = a_ref[...].astype(jnp.bfloat16)  # int8 -> bf16 is exact (|q| <= 127)
        if xw_resident:
            start = pl.multiple_of(cols_ref[i, j] * tk, tk)
            xw_tile = xw_ref[pl.ds(start, tk), :]
        else:
            xw_tile = xw_ref[...]
        acc_ref[...] += jnp.dot(a_bf, xw_tile, preferred_element_type=jnp.float32)

    @pl.when(j == pl.num_programs(1) - 1)
    def _():
        # Per-row int8 dequant scale + (BN-folded) bias.
        h = acc_ref[...] * rs_ref[...] + b_ref[...]
        if is_final:
            # log_softmax over the (padded) class axis; pad columns masked out.
            col = jax.lax.broadcasted_iota(jnp.int32, h.shape, 1)
            h = jnp.where(col < valid_cols, h, NEG_BIG)
            m = jnp.max(h, axis=-1, keepdims=True)
            z = h - m
            lse = jnp.log(jnp.sum(jnp.exp(z), axis=-1, keepdims=True))
            out_ref[...] = (z - lse).astype(out_ref.dtype)
        else:
            h = jnp.maximum(h, 0.0)
            # Keep padded nodes exactly zero so they never pollute later layers.
            row = i * tm + jax.lax.broadcasted_iota(jnp.int32, h.shape, 0)
            h = jnp.where(row < valid_rows, h, 0.0)
            out_ref[...] = h.astype(out_ref.dtype)


def aggregate_layer(a_q, row_scale, xw, b_f32, cols, cnt, *, tm, tk, is_final,
                    valid_cols, valid_rows, xw_resident, vmem_limit, nnz_blocks):
    n_pad = a_q.shape[0]
    f_out = xw.shape[1]
    out_dtype = jnp.float32 if is_final else jnp.bfloat16
    out_bytes = 4 if is_final else 2
    n_bi = n_pad // tm
    max_blocks = cols.shape[1]

    kernel = functools.partial(
        _agg_kernel, is_final=is_final, valid_cols=valid_cols,
        valid_rows=valid_rows, tm=tm, tk=tk, xw_resident=xw_resident)

    xw_bytes = 2 * n_pad * f_out if xw_resident else 2 * nnz_blocks * tk * f_out
    cost = pl.CostEstimate(
        flops=2 * nnz_blocks * tm * tk * f_out,
        transcendentals=(n_pad * f_out if is_final else 0),
        bytes_accessed=int(nnz_blocks * tm * tk + xw_bytes + 4 * n_pad + 4 * f_out
                           + out_bytes * n_pad * f_out),
    )

    if xw_resident:
        xw_spec = pl.BlockSpec((n_pad, f_out), lambda i, j, cols_r, cnt_r: (0, 0))
    else:
        xw_spec = pl.BlockSpec((tk, f_out), lambda i, j, cols_r, cnt_r: (cols_r[i, j], 0))

    return pl.pallas_call(
        kernel,
        out_shape=jax.ShapeDtypeStruct((n_pad, f_out), out_dtype),
        grid_spec=pltpu.PrefetchScalarGridSpec(
            num_scalar_prefetch=2,  # cols, cnt -> SMEM, visible to index_maps + kernel
            grid=(n_bi, max_blocks),
            in_specs=[
                pl.BlockSpec((tm, tk), lambda i, j, cols_r, cnt_r: (i, cols_r[i, j])),
                xw_spec,
                pl.BlockSpec((tm, 1), lambda i, j, cols_r, cnt_r: (i, 0)),
                pl.BlockSpec((1, f_out), lambda i, j, cols_r, cnt_r: (0, 0)),
            ],
            out_specs=pl.BlockSpec((tm, f_out), lambda i, j, cols_r, cnt_r: (i, 0)),
            scratch_shapes=[pltpu.VMEM((tm, f_out), jnp.float32)],
        ),
        compiler_params=pltpu.CompilerParams(
            dimension_semantics=("parallel", "arbitrary"),
            vmem_limit_bytes=vmem_limit,
        ),
        cost_estimate=cost,
    )(cols, cnt, a_q, xw, row_scale, b_f32)


# --------------------- Plain-JAX glue: params, folding, full forward ---------------------


def init_gcn_params(key, input_dim, hidden_dim, output_dim, num_layers):
    dims = [input_dim] + [hidden_dim] * (num_layers - 1) + [output_dim]
    params = []
    for i in range(num_layers):
        key, kw = jax.random.split(key)
        fan_in, fan_out = dims[i], dims[i + 1]
        scale = jnp.sqrt(6.0 / (fan_in + fan_out))  # Glorot-style GCNConv init
        w = jax.random.uniform(kw, (fan_in, fan_out), jnp.float32, -scale, scale)
        b = jnp.zeros((1, fan_out), jnp.float32)
        layer = {"w": w, "b": b}
        if i < num_layers - 1:
            # BatchNorm1d defaults; eval mode uses running stats.
            layer["gamma"] = jnp.ones((1, fan_out), jnp.float32)
            layer["beta"] = jnp.zeros((1, fan_out), jnp.float32)
            layer["mean"] = jnp.zeros((1, fan_out), jnp.float32)
            layer["var"] = jnp.ones((1, fan_out), jnp.float32)
        params.append(layer)
    return params


def normalize_adjacency(adj):
    # gcn_norm: A_hat = D^-1/2 (A + I) D^-1/2
    n = adj.shape[0]
    a = adj + jnp.eye(n, dtype=adj.dtype)
    deg = jnp.sum(a, axis=1)
    d_inv_sqrt = jnp.where(deg > 0, 1.0 / jnp.sqrt(deg), 0.0)
    return a * d_inv_sqrt[:, None] * d_inv_sqrt[None, :]


def quantize_adj_rows(a_hat):
    """Symmetric per-row int8 quantization of A_hat: A ~= diag(row_scale) @ A_q."""
    row_max = jnp.max(jnp.abs(a_hat), axis=1, keepdims=True)
    row_scale = jnp.where(row_max > 0, row_max / 127.0, 1.0).astype(jnp.float32)
    a_q = jnp.round(a_hat / row_scale).astype(jnp.int8)
    return a_q, row_scale


def _fold_bn(layer, is_final):
    # Eval-mode BN folded into the linear weight/bias (per-feature scale commutes
    # through A_hat @ (X @ W)).
    w, b = layer["w"], layer["b"]
    if is_final:
        return w, b
    scale = layer["gamma"] * jax.lax.rsqrt(layer["var"] + BN_EPS)
    return w * scale, (b - layer["mean"]) * scale + layer["beta"]


def _block_structure(a_np, tm, tk):
    """Per row-tile: column-block ids of non-empty (tm, tk) blocks (padded by repetition)."""
    n_bi = a_np.shape[0] // tm
    n_bk = a_np.shape[1] // tk
    nz = np.abs(a_np.astype(np.int32)).reshape(n_bi, tm, n_bk, tk).max(axis=(1, 3)) > 0
    cnt = nz.sum(axis=1).astype(np.int32)
    max_blocks = max(1, int(cnt.max()))
    cols = np.zeros((n_bi, max_blocks), np.int32)
    for r in range(n_bi):
        idx = np.nonzero(nz[r])[0].astype(np.int32)
        if idx.size:
            cols[r, : idx.size] = idx
            cols[r, idx.size:] = idx[-1]  # repeat last block -> no extra DMA, dot skipped
    return jnp.asarray(cols), jnp.asarray(cnt), max_blocks, int(cnt.sum())


def gcn_forward(params, x, a_hat, *, tm_pref=512, tk_pref=1024):
    n, f_in = x.shape
    out_dim = params[-1]["w"].shape[1]

    # Tiles are multiples of 128 that divide n_pad = round_up(n, 128): at most 127
    # rows/cols of padding on the dense N^2 adjacency.  Clamp tm so the parallel row
    # axis has >= 2 tiles when possible (v7x megacore).
    n_pad = _round_up(n, LANE)
    tm_pref_eff = tm_pref if n_pad < 2 * LANE else min(tm_pref, n_pad // 2)
    tm = _pick_tile(n_pad, tm_pref_eff)
    tk = _pick_tile(n_pad, tk_pref)

    # 8-bit adjacency with per-row scale (scale applied in the aggregation epilogue).
    a_q, row_scale = quantize_adj_rows(a_hat)
    a_q_pad = jnp.zeros((n_pad, n_pad), jnp.int8).at[:n, :n].set(a_q)
    rs_pad = jnp.ones((n_pad, 1), jnp.float32).at[:n, :].set(row_scale)

    # Block-sparsity metadata (host-side, once per graph).
    cols, cnt, _, nnz_blocks = _block_structure(np.asarray(a_q_pad), tm, tk)

    f_in_pad = _round_up(f_in, LANE)
    x_cur = jnp.zeros((n_pad, f_in_pad), jnp.bfloat16).at[:n, :f_in].set(
        x.astype(jnp.bfloat16))

    vmem_cap = _vmem_cap_bytes()

    out = None
    for li, layer in enumerate(params):
        is_final = li == len(params) - 1
        w_eff, b_eff = _fold_bn(layer, is_final)
        f_out = w_eff.shape[1]
        f_out_pad = _round_up(f_out, LANE)

        w_pad = jnp.zeros((x_cur.shape[1], f_out_pad), jnp.float32)
        w_pad = w_pad.at[: w_eff.shape[0], :f_out].set(w_eff)
        b_pad = jnp.zeros((1, f_out_pad), jnp.float32).at[:, :f_out].set(b_eff)

        # --- XW = X @ W (row-tiled, W resident) ---
        xw_budget = (2 * tm * x_cur.shape[1] * 2          # X tiles (double-buffered, bf16)
                     + 2 * x_cur.shape[1] * f_out_pad * 2  # W (budget 2 bufs, bf16)
                     + 2 * tm * f_out_pad * 2)             # out tiles (bf16)
        xw_vmem = int(min(0.9 * vmem_cap, max(32 << 20, 1.5 * xw_budget)))
        xw = compute_xw(x_cur, w_pad.astype(jnp.bfloat16), tm=tm, vmem_limit=xw_vmem)

        # --- A_hat @ XW with fused dequant-scale + bias + relu / masked log_softmax ---
        out_bytes = 4 if is_final else 2
        xw_res_bytes = 2 * n_pad * f_out_pad
        xw_resident = xw_res_bytes <= min(XW_RESIDENT_LIMIT, vmem_cap // 4)
        agg_budget = (2 * tm * tk * 1                                       # int8 A tiles
                      + (2 * xw_res_bytes if xw_resident else 2 * tk * f_out_pad * 2 * 2)
                      + 2 * (tm * 4 + f_out_pad * 4)                        # row scale + bias
                      + 2 * tm * f_out_pad * out_bytes                      # out tiles
                      + tm * f_out_pad * 4)                                 # f32 accumulator
        agg_vmem = int(min(0.9 * vmem_cap, max(32 << 20, 1.5 * agg_budget)))
        out = aggregate_layer(
            a_q_pad, rs_pad, xw, b_pad, cols, cnt, tm=tm, tk=tk,
            is_final=is_final, valid_cols=f_out, valid_rows=n,
            xw_resident=xw_resident, vmem_limit=agg_vmem, nnz_blocks=nnz_blocks)
        x_cur = out  # bf16 activations between hidden layers

    return out[:n, :out_dim]  # f32 log-probabilities


def gcn_reference(params, x, a_hat):
    # Pure f32 JAX reference (eval mode), for correctness checking.
    for li, layer in enumerate(params):
        is_final = li == len(params) - 1
        h = a_hat @ (x @ layer["w"]) + layer["b"]
        if is_final:
            return jax.nn.log_softmax(h, axis=-1)
        inv_std = jax.lax.rsqrt(layer["var"] + BN_EPS)
        h = (h - layer["mean"]) * inv_std * layer["gamma"] + layer["beta"]
        x = jnp.maximum(h, 0.0)
    return x


if __name__ == "__main__":
    # Small synthetic problem consistent with the module's forward.
    num_nodes = 16
    input_dim = 16
    hidden_dim = 32
    output_dim = 8
    num_layers = 3

    key = jax.random.PRNGKey(0)
    key, kx, ka, kp = jax.random.split(key, 4)

    x = jax.random.normal(kx, (num_nodes, input_dim), jnp.float32)

    # Random symmetric binary adjacency (no self loops); normalize like gcn_norm.
    raw = jax.random.uniform(ka, (num_nodes, num_nodes))
    adj = (raw + raw.T > 1.3).astype(jnp.float32)
    adj = adj * (1.0 - jnp.eye(num_nodes, dtype=jnp.float32))
    a_hat = normalize_adjacency(adj)

    params = init_gcn_params(kp, input_dim, hidden_dim, output_dim, num_layers)

    out = gcn_forward(params, x, a_hat)
    out = jax.block_until_ready(out)

    assert out.shape == (num_nodes, output_dim)
    # log_softmax rows should exponentiate-and-sum to ~1.
    row_sums = jnp.sum(jnp.exp(out), axis=-1)
    assert bool(jnp.all(jnp.abs(row_sums - 1.0) < 1e-3))

    # (1) Matched reference: same 8-bit adjacency, f32 math -> isolates kernel numerics.
    a_q_ref, row_scale_ref = quantize_adj_rows(a_hat)
    a_matched = a_q_ref.astype(jnp.float32) * row_scale_ref
    ref_matched = gcn_reference(params, x, a_matched)
    assert bool(jnp.max(jnp.abs(out - ref_matched)) < 0.05)

    # (2) Exact f32 reference (includes bf16 operands + int8 adjacency error).
    ref_exact = gcn_reference(params, x, a_hat)
    assert bool(jnp.max(jnp.abs(out - ref_exact)) < 0.1)

    print("KERNEL_OK")
</pallas_src>

<mosaic_0001>
module attributes {stable_mosaic.version = 11 : i64} {
  func.func @_xw_kernel(%arg0: i32, %arg1: memref<128x128xbf16, #tpu.memory_space<vmem>>, %arg2: memref<128x128xbf16, #tpu.memory_space<vmem>>, %arg3: memref<128x128xbf16, #tpu.memory_space<vmem>>) attributes {dimension_semantics = [#tpu.dimension_semantics<parallel>], iteration_bounds = array<i64: 1>, scalar_prefetch = 0 : i64, scratch_operands = 0 : i64, tpu.core_type = #tpu.core_type<tc>, window_params = [{transform_indices = @transform_0, window_bounds = array<i64: 128, 128>}, {pipeline_mode = #tpu.pipeline_mode<synchronous>, transform_indices = @transform_1, window_bounds = array<i64: 128, 128>}, {transform_indices = @transform_2, window_bounds = array<i64: 128, 128>}]} {
    %c0 = arith.constant 0 : index
    %c0_0 = arith.constant 0 : index
    %0 = vector.load %arg1[%c0, %c0_0] : memref<128x128xbf16, #tpu.memory_space<vmem>>, vector<128x128xbf16>
    %c0_1 = arith.constant 0 : index
    %c0_2 = arith.constant 0 : index
    %1 = vector.load %arg2[%c0_1, %c0_2] : memref<128x128xbf16, #tpu.memory_space<vmem>>, vector<128x128xbf16>
    %cst = arith.constant dense<0.000000e+00> : vector<128x128xf32>
    %2 = tpu.matmul %0, %1, %cst {dimension_numbers = #tpu.dot_dimension_numbers<[1], [0], [0], [1], [0, 0, 1, 1], [], []>} : vector<128x128xbf16>, vector<128x128xbf16>, vector<128x128xf32> -> vector<128x128xf32>
    %3 = arith.truncf %2 : vector<128x128xf32> to vector<128x128xbf16>
    %c0_3 = arith.constant 0 : index
    %c0_4 = arith.constant 0 : index
    %4 = vector.load %arg3[%c0_3, %c0_4] : memref<128x128xbf16, #tpu.memory_space<vmem>>, vector<128x128xbf16>
    tpu.vector_store %arg3[%c0_3, %c0_4], %3 {strides = array<i32>} : memref<128x128xbf16, #tpu.memory_space<vmem>>, vector<128x128xbf16>,
    return
  }
  func.func @transform_0(%arg0: i32) -> (i32, i32) {
    %c0_i32 = arith.constant 0 : i32
    %c0_i32_0 = arith.constant 0 : i32
    return %arg0, %c0_i32 : i32, i32
  }
  func.func @transform_1(%arg0: i32) -> (i32, i32) {
    %c0_i32 = arith.constant 0 : i32
    %c0_i32_0 = arith.constant 0 : i32
    %c0_i32_1 = arith.constant 0 : i32
    return %c0_i32, %c0_i32_0 : i32, i32
  }
  func.func @transform_2(%arg0: i32) -> (i32, i32) {
    %c0_i32 = arith.constant 0 : i32
    %c0_i32_0 = arith.constant 0 : i32
    return %arg0, %c0_i32 : i32, i32
  }
}

</mosaic_0001>

<bundles_post_ra>
// kernel: tpu_custom_call.1
= control target key start
LH: loop header
LB: loop body
LE: loop exit
PB: predicated region body
PF: predicated region fallthrough
CT: control target
= control target key end

     0   :  { %7 = vsyncpa [#allocation3], 0  ;;  %s681_s0 = inlined_call_operand.hbm [shape: bf16[128,128], index: 0, kind: input, shape index: {}]   ;;  %s682_s1 = inlined_call_operand.hbm [shape: bf16[128,128], index: 1, kind: input, shape index: {}]   ;;  %s683_s2 = inlined_call_operand.hbm [shape: bf16[128,128], index: 2, kind: output, shape index: {}]  }
   0x1   :  { %8 = vsyncpa [#allocation6], 0 }
   0x2   :  { %9 = vsyncpa [#allocation4], 0  ;;  %s616_s9 = smov [#allocation2]   ;;  %s544_s13 = scalar_lea.hbm %s681_s0, 1024 }
   0x3   :  { %s15_s10 = sshll.u32 %s616_s9, 4  ;;  %p545_p0 = scmp.ne.s32.totalorder %s681_s0, %s544_s13  ;;  %s16_s10 = int_to_ptr.vmem [resolvable:$true] %s15_s10 }
   0x4   :  { %p548_p1 = scmp.lt.u32.totalorder %s544_s13, %s681_s0 }
   0x6   :  { %p550_p2 = pnand %p548_p1, %p545_p0 }
   0x8   :  { %553 = shalt.err (!%p550_p2)
}
   0x9   :  { %s554_s18 = scalar_lea.vmem %s16_s10, 1024  ;;  %p559_p4 = scmp.lt.s32.totalorder %s16_s10, %s16_s10 }
   0xa   :  { %p555_p3 = scmp.ne.s32.totalorder %s16_s10, %s554_s18  ;;  %p560_p5 = scmp.lt.s32.totalorder %s554_s18, %s554_s18 }
   0xc   :  { %p561_p6 = por %p560_p5, %p559_p4 }
   0xe   :  { %p562_p7 = pnand %p561_p6, %p555_p3 }
  0x10   :  { %565 = shalt.err (!%p562_p7)
}
  0x11   :  { %s617_s19 = smov 64   ;;  %s618_s20 = smov 4  }
  0x12   :  { %21 = dma.hbm_to_vmem [thread:$0]  %s681_s0, 1024, %s16_s10, [#allocation3], %s617_s19, %s617_s19, %s618_s20  }
  0x13   :  { %s619_s23 = smov [#allocation5]   ;;  %s566_s27 = scalar_lea.hbm %s682_s1, 1024 }
  0x14   :  { %s27_s24 = sshll.u32 %s619_s23, 4  ;;  %p567_p8 = scmp.ne.s32.totalorder %s682_s1, %s566_s27  ;;  %s28_s24 = int_to_ptr.vmem [resolvable:$true] %s27_s24 }
  0x15   :  { %p570_p9 = scmp.lt.u32.totalorder %s566_s27, %s682_s1 }
  0x17   :  { %p572_p10 = pnand %p570_p9, %p567_p8 }
  0x19   :  { %575 = shalt.err (!%p572_p10)
}
  0x1a   :  { %s576_s4 = scalar_lea.vmem %s28_s24, 1024  ;;  %p581_p12 = scmp.lt.s32.totalorder %s28_s24, %s28_s24 }
  0x1b   :  { %p577_p11 = scmp.ne.s32.totalorder %s28_s24, %s576_s4  ;;  %p582_p13 = scmp.lt.s32.totalorder %s576_s4, %s576_s4 }
  0x1d   :  { %p583_p0 = por %p582_p13, %p581_p12 }
  0x1f   :  { %p584_p1 = pnand %p583_p0, %p577_p11 }
  0x21   :  { %587 = shalt.err (!%p584_p1)
}
  0x22   :  { %33 = dma.hbm_to_vmem [thread:$0]  %s682_s1, 1024, %s28_s24, [#allocation6], %s617_s19, %s617_s19, %s618_s20  }
  0x23   :  { %610 = dma.done.wait [#allocation3], 1024  }
  0x24   :  { %611 = vsyncadd [#allocation3], 4294966272 }
  0x25   :  { %612 = dma.done.wait [#allocation6], 1024  }
  0x26   :  { %613 = vsyncadd [#allocation6], 4294966272  ;;  %v528_v0 = vld [vmem:[#allocation5] sm:$0xff]   ;;  %v529_v1 = vld [vmem:[#allocation5 + $0x8] sm:$0xff]   ;;  %s620_s1 = smov [#allocation7]  }
  0x27   :  { %475 = vmatprep.subr.bf16.mxu0 %v528_v0  ;;  %507 = vmatprep.subr.bf16.mxu1 %v528_v0  ;;  %v530_v2 = vld [vmem:[#allocation5 + $0x10] sm:$0xff]   ;;  %v531_v3 = vld [vmem:[#allocation5 + $0x18] sm:$0xff]   ;;  %v536_v4 = vld [vmem:[#allocation2] sm:$0xff]   ;;  %s351_s6 = sshll.u32 %s620_s1, 4  ;;  %s352_s6 = int_to_ptr.vmem [resolvable:$true] %s351_s6 }
  0x28   :  { %476 = vmatpush3.bf16.msra.mxu0 %v528_v0  ;;  %515 = vmatpush3.bf16.msra.mxu1 %v528_v0  ;;  %v537_v5 = vld [vmem:[#allocation2 + $0x20] sm:$0xff]   ;;  %v533_v7 = vld [vmem:[#allocation5 + $0x28] sm:$0xff]   ;;  %v534_v8 = vld [vmem:[#allocation5 + $0x30] sm:$0xff]   ;;  %s588_s7 = scalar_lea.vmem %s352_s6, 1024  ;;  %p593_p3 = scmp.lt.s32.totalorder %s352_s6, %s352_s6 }
  0x29   :  { %477 = vmatprep.subr.bf16.mxu0 %v529_v1  ;;  %508 = vmatprep.subr.bf16.mxu1 %v529_v1  ;;  %v532_v6 = vld [vmem:[#allocation5 + $0x20] sm:$0xff]   ;;  %v535_v9 = vld [vmem:[#allocation5 + $0x38] sm:$0xff]   ;;  %v538_v10 = vld [vmem:[#allocation2 + $0x8] sm:$0xff]   ;;  %p589_p2 = scmp.ne.s32.totalorder %s352_s6, %s588_s7  ;;  %p594_p4 = scmp.lt.s32.totalorder %s588_s7, %s588_s7 }
  0x2a   :  { %491 = vmatprep.mubr.bf16.mxu0 %v536_v4  ;;  %499 = vmatprep.mubr.bf16.mxu1 %v537_v5  ;;  %v539_v11 = vld [vmem:[#allocation2 + $0x28] sm:$0xff]   ;;  %v540_v12 = vld [vmem:[#allocation2 + $0x10] sm:$0xff]   ;;  %v542_v14 = vld [vmem:[#allocation2 + $0x18] sm:$0xff]  }
  0x2b   :  { %v541_v13 = vld [vmem:[#allocation2 + $0x30] sm:$0xff]   ;;  %v543_v15 = vld [vmem:[#allocation2 + $0x38] sm:$0xff]   ;;  %p595_p5 = por %p594_p4, %p593_p3 }
  0x2c   :  { %478 = vmatpush3.bf16.msra.mxu0 %v529_v1  ;;  %516 = vmatpush3.bf16.msra.mxu1 %v529_v1 }
  0x2d   :  { %479 = vmatprep.subr.bf16.mxu0 %v530_v2  ;;  %509 = vmatprep.subr.bf16.mxu1 %v530_v2  ;;  %p596_p6 = pnand %p595_p5, %p589_p2 }
  0x30   :  { %480 = vmatpush3.bf16.msra.mxu0 %v530_v2  ;;  %517 = vmatpush3.bf16.msra.mxu1 %v530_v2 }
  0x31   :  { %481 = vmatprep.subr.bf16.mxu0 %v531_v3  ;;  %510 = vmatprep.subr.bf16.mxu1 %v531_v3 }
  0x34   :  { %482 = vmatpush3.bf16.msra.mxu0 %v531_v3  ;;  %518 = vmatpush3.bf16.msra.mxu1 %v531_v3 }
  0x35   :  { %483 = vmatprep.subr.bf16.mxu0 %v532_v6  ;;  %511 = vmatprep.subr.bf16.mxu1 %v532_v6 }
  0x38   :  { %484 = vmatpush3.bf16.msra.mxu0 %v532_v6  ;;  %519 = vmatpush3.bf16.msra.mxu1 %v532_v6 }
  0x39   :  { %485 = vmatprep.subr.bf16.mxu0 %v533_v7  ;;  %512 = vmatprep.subr.bf16.mxu1 %v533_v7 }
  0x3c   :  { %486 = vmatpush3.bf16.msra.mxu0 %v533_v7  ;;  %520 = vmatpush3.bf16.msra.mxu1 %v533_v7 }
  0x3d   :  { %487 = vmatprep.subr.bf16.mxu0 %v534_v8  ;;  %513 = vmatprep.subr.bf16.mxu1 %v534_v8 }
  0x40   :  { %488 = vmatpush3.bf16.msra.mxu0 %v534_v8  ;;  %521 = vmatpush3.bf16.msra.mxu1 %v534_v8 }
  0x41   :  { %489 = vmatprep.subr.bf16.mxu0 %v535_v9  ;;  %514 = vmatprep.subr.bf16.mxu1 %v535_v9 }
  0x44   :  { %490 = vmatpush3.bf16.msra.mxu0 %v535_v9  ;;  %522 = vmatpush3.bf16.msra.mxu1 %v535_v9 }
  0x47   :  { %492 = vmatmul.mubr.bf16.vlgmr.msra.gmra.mrb[0].mxu0 %v538_v10  ;;  %500 = vmatmul.mubr.bf16.vlgmr.msra.gmra.mrb[0].mxu1 %v539_v11 }
  0x48   :  { %495 = vmatprep.mubr.bf16.mxu0 %v540_v12  ;;  %503 = vmatprep.mubr.bf16.mxu1 %v541_v13 }
  0x4f   :  { %496 = vmatmul.mubr.bf16.gmra.mrb[4].mxu0 %v542_v14  ;;  %504 = vmatmul.mubr.bf16.gmra.mrb[4].mxu1 %v543_v15 }
 0x11a   :  { %v493_v16 = vpop.f32.mrb[0].mxu0  ;;  %v501_v17 = vpop.f32.mrb[0].mxu1 }
 0x11b   :  { %v203_v18 = vpop.f32.mrb[1].mxu0  ;;  %v235_v19 = vpop.f32.mrb[1].mxu1 }
 0x11c   :  { %v494_v20 = vpop.f32.mrb[2].mxu0  ;;  %v502_v21 = vpop.f32.mrb[2].mxu1 }
 0x11d   :  { %v420_v22 = vpack.c.bf16 %v494_v20, %v493_v16  ;;  %v440_v23 = vpack.c.bf16 %v502_v21, %v501_v17  ;;  %v206_v24 = vpop.f32.mrb[3].mxu0  ;;  %v238_v25 = vpop.f32.mrb[3].mxu1 }
 0x11e   :  { %v415_v26 = vpack.c.bf16 %v206_v24, %v203_v18  ;;  %v435_v27 = vpack.c.bf16 %v238_v25, %v235_v19 }
 0x11f   :  { %452 = vst [vmem:[#allocation7 + $0x8] sm:$0xff] %v420_v22   ;;  %456 = vst [vmem:[#allocation7 + $0x28] sm:$0xff] %v440_v23  }
 0x120   :  { %416 = vst [vmem:[#allocation7] sm:$0xff] %v415_v26   ;;  %455 = vst [vmem:[#allocation7 + $0x20] sm:$0xff] %v435_v27  }
 0x122   :  { %v497_v28 = vpop.f32.mrb[4].mxu0  ;;  %v505_v29 = vpop.f32.mrb[4].mxu1 }
 0x123   :  { %v219_v30 = vpop.f32.mrb[5].mxu0  ;;  %v251_v31 = vpop.f32.mrb[5].mxu1 }
 0x124   :  { %v498_v32 = vpop.f32.mrb[6].mxu0  ;;  %v506_v33 = vpop.f32.mrb[6].mxu1 }
 0x125   :  { %v430_v34 = vpack.c.bf16 %v498_v32, %v497_v28  ;;  %v450_v35 = vpack.c.bf16 %v506_v33, %v505_v29  ;;  %v222_v36 = vpop.f32.mrb[7].mxu0  ;;  %v254_v37 = vpop.f32.mrb[7].mxu1 }
 0x126   :  { %v425_v38 = vpack.c.bf16 %v222_v36, %v219_v30  ;;  %v445_v39 = vpack.c.bf16 %v254_v37, %v251_v31 }
 0x127   :  { %454 = vst [vmem:[#allocation7 + $0x18] sm:$0xff] %v430_v34   ;;  %458 = vst [vmem:[#allocation7 + $0x38] sm:$0xff] %v450_v35  }
 0x128   :  { %453 = vst [vmem:[#allocation7 + $0x10] sm:$0xff] %v425_v38   ;;  %457 = vst [vmem:[#allocation7 + $0x30] sm:$0xff] %v445_v39  }
 0x129   :  { %599 = shalt.err (!%p596_p6)
}
 0x12a   :  { %s600_s10 = scalar_lea.hbm %s683_s2, 1024 }
 0x12b   :  { %p601_p7 = scmp.ne.s32.totalorder %s683_s2, %s600_s10  ;;  %p604_p8 = scmp.lt.u32.totalorder %s600_s10, %s683_s2 }
 0x12d   :  { %p606_p9 = pnand %p604_p8, %p601_p7 }
 0x12f   :  { %609 = shalt.err (!%p606_p9)
}
 0x130   :  { %357 = dma.vmem_to_hbm [thread:$0]  %s352_s6, 1024, %s683_s2, [#allocation4], %s617_s19, %s617_s19, %s618_s20  }
 0x131   :  { %614 = dma.done.wait [#allocation4], 1024  }
 0x132   :  { %615 = vsyncadd [#allocation4], 4294966272 }
 0x133   :  { %361 = vsyncpa [#allocation3], 1 }
 0x134   :  { %362 = vsyncpa [#allocation6], 1 }
 0x135   :  { %363 = vsyncpa [#allocation4], 1 }

</bundles_post_ra>
